<compile_context>
chip_gen: v6e
topology: v6e:2x2x1
jax: 0.10.0
libtpu: 0.0.40
codegen_flags: <defaults>
</compile_context>

<pallas_src>
import functools

import jax
import jax.numpy as jnp
from jax.experimental import pallas as pl
from jax.experimental.pallas import tpu as pltpu

LANE = 128


def _round_up(n, m=LANE):
    return ((n + m - 1) // m) * m


# ----------------------------------------------------------------------------
# Fused kernel:
#   [Linear (+res) -> BN(train) -> act] x num_layers -> Linear -> sigmoid
# ----------------------------------------------------------------------------
def _fused_mlp_kernel(x_ref, w_ref, bgb_ref, w_out_ref, b_out_ref, o_ref, *,
                      num_layers, hid_pad, eps, neg_slope):
    inv_b = 1.0 / float(x_ref.shape[0])          # static batch size
    out = x_ref[...]                             # (B, Kpad) f32, zero-padded

    for i in range(num_layers):
        wi = w_ref[i]                            # (Kpad, Hpad) bf16
        if i > 0 and wi.shape[0] != hid_pad:
            wi = wi[:hid_pad, :]                 # layers>0 contract over Hpad only
        bgb = bgb_ref[i]                         # (3, Hpad) f32: bias/gamma/beta

        # MXU matmul: bf16 operands, f32 accumulation.
        y = jnp.dot(out.astype(jnp.bfloat16), wi,
                    preferred_element_type=jnp.float32)
        y = y + bgb[0:1, :]                      # bias broadcast
        if i > 0:
            y = y + out                          # residual BEFORE BN (matches ref)

        # BatchNorm1d (training mode): two independent reductions.
        s1 = jnp.sum(y, axis=0, keepdims=True)           # (1, Hpad)
        s2 = jnp.sum(y * y, axis=0, keepdims=True)       # (1, Hpad)
        mean = s1 * inv_b
        var = jnp.maximum(s2 * inv_b - mean * mean, 0.0)  # biased var, clamp >= 0
        y = (y - mean) * jax.lax.rsqrt(var + eps)
        y = y * bgb[1:2, :] + bgb[2:3, :]                 # gamma / beta

        if i == 0:
            out = jnp.where(y >= 0.0, y, neg_slope * y)   # leaky_relu only
        else:
            out = jnp.maximum(y, 0.0)                     # relu(leaky_relu(y)) == relu(y)

    # Output head: sigmoid(fc_out(out)) via tanh (single EUP op, bounded <= 1).
    y = jnp.dot(out.astype(jnp.bfloat16), w_out_ref[...],
                preferred_element_type=jnp.float32)
    y = y + b_out_ref[...]
    o_ref[...] = (0.5 * jnp.tanh(0.5 * y) + 0.5).astype(o_ref.dtype)


# ----------------------------------------------------------------------------
# Wrapper
# ----------------------------------------------------------------------------
def ann_relu_2_forward(params, x, num_layers, num_classes,
                       eps=1e-5, neg_slope=0.01):
    B, C = x.shape
    k_pad, hid_pad = params["w_stack"].shape[1], params["w_stack"].shape[2]
    cls_pad = params["w_out"].shape[1]

    # Zero-pad the input to k_pad lanes (inert: padded weight rows are zero).
    x_pad = x if C == k_pad else jnp.zeros((B, k_pad), jnp.float32).at[:, :C].set(x)

    kernel = functools.partial(_fused_mlp_kernel, num_layers=num_layers,
                               hid_pad=hid_pad, eps=eps, neg_slope=neg_slope)

    flops = 2 * B * (k_pad * hid_pad
                     + (num_layers - 1) * hid_pad * hid_pad
                     + hid_pad * cls_pad)
    bytes_accessed = (x_pad.size * 4
                      + params["w_stack"].size * 2 + params["bgb"].size * 4
                      + params["w_out"].size * 2 + params["b_out"].size * 4
                      + B * cls_pad * 4)
    transcendentals = num_layers * hid_pad + B * cls_pad   # rsqrt + tanh

    vmem = lambda: pl.BlockSpec(memory_space=pltpu.MemorySpace.VMEM)
    out_pad = pl.pallas_call(
        kernel,
        out_shape=jax.ShapeDtypeStruct((B, cls_pad), jnp.float32),
        grid=(),
        in_specs=[vmem() for _ in range(5)],
        out_specs=vmem(),
        cost_estimate=pl.CostEstimate(flops=flops,
                                      transcendentals=transcendentals,
                                      bytes_accessed=bytes_accessed),
    )(x_pad, params["w_stack"], params["bgb"], params["w_out"], params["b_out"])
    return out_pad[:, :num_classes]


# ----------------------------------------------------------------------------
# Parameter init: packed, pre-transposed (in, out), zero-padded to 128 lanes.
#   w_stack : (L, Kpad, Hpad) bf16   (layer 0 uses rows [:input_channels])
#   bgb     : (L, 3, Hpad)    f32    (rows: bias, gamma, beta; padded lanes 0)
#   w_out   : (Hpad, Cpad)    bf16
#   b_out   : (1, Cpad)       f32
# ----------------------------------------------------------------------------
def init_params(key, input_channels, num_classes, hidden_dim, num_layers):
    hid_pad = _round_up(hidden_dim)
    cls_pad = _round_up(num_classes)
    k_pad = max(_round_up(input_channels), hid_pad)

    w_stack = jnp.zeros((num_layers, k_pad, hid_pad), jnp.float32)
    bgb = jnp.zeros((num_layers, 3, hid_pad), jnp.float32)
    for i in range(num_layers):
        in_f = input_channels if i == 0 else hidden_dim
        key, kw, kb = jax.random.split(key, 3)
        bound = 1.0 / float(in_f) ** 0.5
        w = jax.random.uniform(kw, (in_f, hidden_dim), jnp.float32, -bound, bound)
        b = jax.random.uniform(kb, (hidden_dim,), jnp.float32, -bound, bound)
        w_stack = w_stack.at[i, :in_f, :hidden_dim].set(w)
        bgb = bgb.at[i, 0, :hidden_dim].set(b)      # bias
        bgb = bgb.at[i, 1, :hidden_dim].set(1.0)    # gamma = 1 (padded lanes 0)
        # beta row stays 0 (BatchNorm1d default)

    key, kw, kb = jax.random.split(key, 3)
    bound = 1.0 / float(hidden_dim) ** 0.5
    w_o = jax.random.uniform(kw, (hidden_dim, num_classes), jnp.float32, -bound, bound)
    b_o = jax.random.uniform(kb, (num_classes,), jnp.float32, -bound, bound)
    w_out = jnp.zeros((hid_pad, cls_pad), jnp.float32).at[:hidden_dim, :num_classes].set(w_o)
    b_out = jnp.zeros((1, cls_pad), jnp.float32).at[0, :num_classes].set(b_o)

    return {
        "w_stack": w_stack.astype(jnp.bfloat16),
        "bgb": bgb,
        "w_out": w_out.astype(jnp.bfloat16),
        "b_out": b_out,
    }


# ----------------------------------------------------------------------------
# Pure-JAX reference (training-mode BN, f32 math on the bf16-stored weights).
# The kernel additionally rounds activations to bf16 at each MXU boundary,
# which introduces ~1e-3-level deviations; tolerance below accounts for that.
# ----------------------------------------------------------------------------
def reference_forward(params, x, num_layers, input_channels, hidden_dim,
                      num_classes, eps=1e-5, neg_slope=0.01):
    w_stack = params["w_stack"].astype(jnp.float32)
    bgb = params["bgb"]
    w_out = params["w_out"].astype(jnp.float32)
    b_out = params["b_out"]

    out = x
    for i in range(num_layers):
        in_f = input_channels if i == 0 else hidden_dim
        w = w_stack[i, :in_f, :hidden_dim]
        b = bgb[i, 0, :hidden_dim]
        g = bgb[i, 1, :hidden_dim]
        beta = bgb[i, 2, :hidden_dim]
        y = out @ w + b
        if i > 0:
            y = y + out
        mean = y.mean(axis=0)
        var = ((y - mean) ** 2).mean(axis=0)                 # biased variance
        y = (y - mean) * jax.lax.rsqrt(var + eps) * g + beta
        y = jnp.where(y >= 0.0, y, neg_slope * y)            # leaky_relu
        if i > 0:
            y = jnp.maximum(y, 0.0)                          # relu
        out = y
    y = out @ w_out[:hidden_dim, :num_classes] + b_out[0, :num_classes]
    return jax.nn.sigmoid(y)


# ----------------------------------------------------------------------------
if __name__ == "__main__":
    batch = 8
    input_channels = 16
    hidden_dim = 32
    num_classes = 4
    num_layers = 3

    key = jax.random.PRNGKey(0)
    key, kx = jax.random.split(key)
    x = jax.random.normal(kx, (batch, input_channels), jnp.float32)

    params = init_params(key, input_channels, num_classes, hidden_dim, num_layers)

    out = ann_relu_2_forward(params, x, num_layers, num_classes)
    out = jax.block_until_ready(out)
    assert out.shape == (batch, num_classes)

    ref = reference_forward(params, x, num_layers, input_channels,
                            hidden_dim, num_classes)
    max_err = float(jnp.max(jnp.abs(out - ref)))
    assert jnp.allclose(out, ref, atol=2e-2), max_err
    assert bool(jnp.all((out >= 0.0) & (out <= 1.0 + 1e-6)))
    print("KERNEL_OK")
</pallas_src>

<mosaic_0001>
module attributes {stable_mosaic.version = 11 : i64} {
  func.func @_fused_mlp_kernel(%arg0: memref<8x128xf32, #tpu.memory_space<vmem>>, %arg1: memref<3x128x128xbf16, #tpu.memory_space<vmem>>, %arg2: memref<3x3x128xf32, #tpu.memory_space<vmem>>, %arg3: memref<128x128xbf16, #tpu.memory_space<vmem>>, %arg4: memref<1x128xf32, #tpu.memory_space<vmem>>, %arg5: memref<8x128xf32, #tpu.memory_space<vmem>>) attributes {dimension_semantics = [], scalar_prefetch = 0 : i64, scratch_operands = 0 : i64, tpu.core_type = #tpu.core_type<tc>} {
    %c0 = arith.constant 0 : index
    %c0_0 = arith.constant 0 : index
    %0 = vector.load %arg0[%c0, %c0_0] : memref<8x128xf32, #tpu.memory_space<vmem>>, vector<8x128xf32>
    %c0_1 = arith.constant 0 : index
    %c0_2 = arith.constant 0 : index
    %c0_3 = arith.constant 0 : index
    %1 = vector.load %arg1[%c0_1, %c0_2, %c0_3] : memref<3x128x128xbf16, #tpu.memory_space<vmem>>, vector<1x128x128xbf16>
    %2 = vector.shape_cast %1 : vector<1x128x128xbf16> to vector<128x128xbf16>
    %c0_4 = arith.constant 0 : index
    %c0_5 = arith.constant 0 : index
    %c0_6 = arith.constant 0 : index
    %3 = vector.load %arg2[%c0_4, %c0_5, %c0_6] : memref<3x3x128xf32, #tpu.memory_space<vmem>>, vector<1x3x128xf32>
    %4 = vector.shape_cast %3 : vector<1x3x128xf32> to vector<3x128xf32>
    %5 = arith.truncf %0 : vector<8x128xf32> to vector<8x128xbf16>
    %cst = arith.constant dense<0.000000e+00> : vector<8x128xf32>
    %6 = tpu.matmul %5, %2, %cst {dimension_numbers = #tpu.dot_dimension_numbers<[1], [0], [0], [1], [0, 0, 1, 1], [], []>} : vector<8x128xbf16>, vector<128x128xbf16>, vector<8x128xf32> -> vector<8x128xf32>
    %7 = vector.extract_strided_slice %4 {offsets = [0, 0], sizes = [1, 128], strides = [1, 1]} : vector<3x128xf32> to vector<1x128xf32>
    %8 = vector.broadcast %7 : vector<1x128xf32> to vector<8x128xf32>
    %9 = arith.addf %6, %8 : vector<8x128xf32>
    %cst_7 = arith.constant dense<0.000000e+00> : vector<128xf32>
    %10 = vector.multi_reduction <add>, %9, %cst_7 [0] : vector<8x128xf32> to vector<128xf32>
    %11 = vector.shape_cast %10 : vector<128xf32> to vector<1x128xf32>
    %12 = arith.mulf %9, %9 : vector<8x128xf32>
    %cst_8 = arith.constant dense<0.000000e+00> : vector<128xf32>
    %13 = vector.multi_reduction <add>, %12, %cst_8 [0] : vector<8x128xf32> to vector<128xf32>
    %14 = vector.shape_cast %13 : vector<128xf32> to vector<1x128xf32>
    %cst_9 = arith.constant 1.250000e-01 : f32
    %15 = vector.broadcast %cst_9 : f32 to vector<1x128xf32>
    %16 = arith.mulf %11, %15 : vector<1x128xf32>
    %cst_10 = arith.constant 1.250000e-01 : f32
    %17 = vector.broadcast %cst_10 : f32 to vector<1x128xf32>
    %18 = arith.mulf %14, %17 : vector<1x128xf32>
    %19 = arith.mulf %16, %16 : vector<1x128xf32>
    %20 = arith.subf %18, %19 : vector<1x128xf32>
    %cst_11 = arith.constant 0.000000e+00 : f32
    %21 = vector.broadcast %cst_11 : f32 to vector<1x128xf32>
    %22 = arith.maximumf %20, %21 : vector<1x128xf32>
    %23 = vector.broadcast %16 : vector<1x128xf32> to vector<8x128xf32>
    %24 = arith.subf %9, %23 : vector<8x128xf32>
    %cst_12 = arith.constant 9.99999974E-6 : f32
    %25 = vector.broadcast %cst_12 : f32 to vector<1x128xf32>
    %26 = arith.addf %22, %25 : vector<1x128xf32>
    %27 = math.rsqrt %26 : vector<1x128xf32>
    %28 = vector.broadcast %27 : vector<1x128xf32> to vector<8x128xf32>
    %29 = arith.mulf %24, %28 : vector<8x128xf32>
    %30 = vector.extract_strided_slice %4 {offsets = [1, 0], sizes = [1, 128], strides = [1, 1]} : vector<3x128xf32> to vector<1x128xf32>
    %31 = vector.broadcast %30 : vector<1x128xf32> to vector<8x128xf32>
    %32 = arith.mulf %29, %31 : vector<8x128xf32>
    %33 = vector.extract_strided_slice %4 {offsets = [2, 0], sizes = [1, 128], strides = [1, 1]} : vector<3x128xf32> to vector<1x128xf32>
    %34 = vector.broadcast %33 : vector<1x128xf32> to vector<8x128xf32>
    %35 = arith.addf %32, %34 : vector<8x128xf32>
    %cst_13 = arith.constant 0.000000e+00 : f32
    %36 = vector.broadcast %cst_13 : f32 to vector<8x128xf32>
    %37 = arith.cmpf oge, %35, %36 : vector<8x128xf32>
    %cst_14 = arith.constant 0.00999999977 : f32
    %38 = vector.broadcast %cst_14 : f32 to vector<8x128xf32>
    %39 = arith.mulf %38, %35 : vector<8x128xf32>
    %40 = arith.select %37, %35, %39 : vector<8x128xi1>, vector<8x128xf32>
    %c1 = arith.constant 1 : index
    %c0_15 = arith.constant 0 : index
    %c0_16 = arith.constant 0 : index
    %41 = vector.load %arg1[%c1, %c0_15, %c0_16] : memref<3x128x128xbf16, #tpu.memory_space<vmem>>, vector<1x128x128xbf16>
    %42 = vector.shape_cast %41 : vector<1x128x128xbf16> to vector<128x128xbf16>
    %c1_17 = arith.constant 1 : index
    %c0_18 = arith.constant 0 : index
    %c0_19 = arith.constant 0 : index
    %43 = vector.load %arg2[%c1_17, %c0_18, %c0_19] : memref<3x3x128xf32, #tpu.memory_space<vmem>>, vector<1x3x128xf32>
    %44 = vector.shape_cast %43 : vector<1x3x128xf32> to vector<3x128xf32>
    %45 = arith.truncf %40 : vector<8x128xf32> to vector<8x128xbf16>
    %cst_20 = arith.constant dense<0.000000e+00> : vector<8x128xf32>
    %46 = tpu.matmul %45, %42, %cst_20 {dimension_numbers = #tpu.dot_dimension_numbers<[1], [0], [0], [1], [0, 0, 1, 1], [], []>} : vector<8x128xbf16>, vector<128x128xbf16>, vector<8x128xf32> -> vector<8x128xf32>
    %47 = vector.extract_strided_slice %44 {offsets = [0, 0], sizes = [1, 128], strides = [1, 1]} : vector<3x128xf32> to vector<1x128xf32>
    %48 = vector.broadcast %47 : vector<1x128xf32> to vector<8x128xf32>
    %49 = arith.addf %46, %48 : vector<8x128xf32>
    %50 = arith.addf %49, %40 : vector<8x128xf32>
    %cst_21 = arith.constant dense<0.000000e+00> : vector<128xf32>
    %51 = vector.multi_reduction <add>, %50, %cst_21 [0] : vector<8x128xf32> to vector<128xf32>
    %52 = vector.shape_cast %51 : vector<128xf32> to vector<1x128xf32>
    %53 = arith.mulf %50, %50 : vector<8x128xf32>
    %cst_22 = arith.constant dense<0.000000e+00> : vector<128xf32>
    %54 = vector.multi_reduction <add>, %53, %cst_22 [0] : vector<8x128xf32> to vector<128xf32>
    %55 = vector.shape_cast %54 : vector<128xf32> to vector<1x128xf32>
    %cst_23 = arith.constant 1.250000e-01 : f32
    %56 = vector.broadcast %cst_23 : f32 to vector<1x128xf32>
    %57 = arith.mulf %52, %56 : vector<1x128xf32>
    %cst_24 = arith.constant 1.250000e-01 : f32
    %58 = vector.broadcast %cst_24 : f32 to vector<1x128xf32>
    %59 = arith.mulf %55, %58 : vector<1x128xf32>
    %60 = arith.mulf %57, %57 : vector<1x128xf32>
    %61 = arith.subf %59, %60 : vector<1x128xf32>
    %cst_25 = arith.constant 0.000000e+00 : f32
    %62 = vector.broadcast %cst_25 : f32 to vector<1x128xf32>
    %63 = arith.maximumf %61, %62 : vector<1x128xf32>
    %64 = vector.broadcast %57 : vector<1x128xf32> to vector<8x128xf32>
    %65 = arith.subf %50, %64 : vector<8x128xf32>
    %cst_26 = arith.constant 9.99999974E-6 : f32
    %66 = vector.broadcast %cst_26 : f32 to vector<1x128xf32>
    %67 = arith.addf %63, %66 : vector<1x128xf32>
    %68 = math.rsqrt %67 : vector<1x128xf32>
    %69 = vector.broadcast %68 : vector<1x128xf32> to vector<8x128xf32>
    %70 = arith.mulf %65, %69 : vector<8x128xf32>
    %71 = vector.extract_strided_slice %44 {offsets = [1, 0], sizes = [1, 128], strides = [1, 1]} : vector<3x128xf32> to vector<1x128xf32>
    %72 = vector.broadcast %71 : vector<1x128xf32> to vector<8x128xf32>
    %73 = arith.mulf %70, %72 : vector<8x128xf32>
    %74 = vector.extract_strided_slice %44 {offsets = [2, 0], sizes = [1, 128], strides = [1, 1]} : vector<3x128xf32> to vector<1x128xf32>
    %75 = vector.broadcast %74 : vector<1x128xf32> to vector<8x128xf32>
    %76 = arith.addf %73, %75 : vector<8x128xf32>
    %cst_27 = arith.constant 0.000000e+00 : f32
    %77 = vector.broadcast %cst_27 : f32 to vector<8x128xf32>
    %78 = arith.maximumf %76, %77 : vector<8x128xf32>
    %c2 = arith.constant 2 : index
    %c0_28 = arith.constant 0 : index
    %c0_29 = arith.constant 0 : index
    %79 = vector.load %arg1[%c2, %c0_28, %c0_29] : memref<3x128x128xbf16, #tpu.memory_space<vmem>>, vector<1x128x128xbf16>
    %80 = vector.shape_cast %79 : vector<1x128x128xbf16> to vector<128x128xbf16>
    %c2_30 = arith.constant 2 : index
    %c0_31 = arith.constant 0 : index
    %c0_32 = arith.constant 0 : index
    %81 = vector.load %arg2[%c2_30, %c0_31, %c0_32] : memref<3x3x128xf32, #tpu.memory_space<vmem>>, vector<1x3x128xf32>
    %82 = vector.shape_cast %81 : vector<1x3x128xf32> to vector<3x128xf32>
    %83 = arith.truncf %78 : vector<8x128xf32> to vector<8x128xbf16>
    %cst_33 = arith.constant dense<0.000000e+00> : vector<8x128xf32>
    %84 = tpu.matmul %83, %80, %cst_33 {dimension_numbers = #tpu.dot_dimension_numbers<[1], [0], [0], [1], [0, 0, 1, 1], [], []>} : vector<8x128xbf16>, vector<128x128xbf16>, vector<8x128xf32> -> vector<8x128xf32>
    %85 = vector.extract_strided_slice %82 {offsets = [0, 0], sizes = [1, 128], strides = [1, 1]} : vector<3x128xf32> to vector<1x128xf32>
    %86 = vector.broadcast %85 : vector<1x128xf32> to vector<8x128xf32>
    %87 = arith.addf %84, %86 : vector<8x128xf32>
    %88 = arith.addf %87, %78 : vector<8x128xf32>
    %cst_34 = arith.constant dense<0.000000e+00> : vector<128xf32>
    %89 = vector.multi_reduction <add>, %88, %cst_34 [0] : vector<8x128xf32> to vector<128xf32>
    %90 = vector.shape_cast %89 : vector<128xf32> to vector<1x128xf32>
    %91 = arith.mulf %88, %88 : vector<8x128xf32>
    %cst_35 = arith.constant dense<0.000000e+00> : vector<128xf32>
    %92 = vector.multi_reduction <add>, %91, %cst_35 [0] : vector<8x128xf32> to vector<128xf32>
    %93 = vector.shape_cast %92 : vector<128xf32> to vector<1x128xf32>
    %cst_36 = arith.constant 1.250000e-01 : f32
    %94 = vector.broadcast %cst_36 : f32 to vector<1x128xf32>
    %95 = arith.mulf %90, %94 : vector<1x128xf32>
    %cst_37 = arith.constant 1.250000e-01 : f32
    %96 = vector.broadcast %cst_37 : f32 to vector<1x128xf32>
    %97 = arith.mulf %93, %96 : vector<1x128xf32>
    %98 = arith.mulf %95, %95 : vector<1x128xf32>
    %99 = arith.subf %97, %98 : vector<1x128xf32>
    %cst_38 = arith.constant 0.000000e+00 : f32
    %100 = vector.broadcast %cst_38 : f32 to vector<1x128xf32>
    %101 = arith.maximumf %99, %100 : vector<1x128xf32>
    %102 = vector.broadcast %95 : vector<1x128xf32> to vector<8x128xf32>
    %103 = arith.subf %88, %102 : vector<8x128xf32>
    %cst_39 = arith.constant 9.99999974E-6 : f32
    %104 = vector.broadcast %cst_39 : f32 to vector<1x128xf32>
    %105 = arith.addf %101, %104 : vector<1x128xf32>
    %106 = math.rsqrt %105 : vector<1x128xf32>
    %107 = vector.broadcast %106 : vector<1x128xf32> to vector<8x128xf32>
    %108 = arith.mulf %103, %107 : vector<8x128xf32>
    %109 = vector.extract_strided_slice %82 {offsets = [1, 0], sizes = [1, 128], strides = [1, 1]} : vector<3x128xf32> to vector<1x128xf32>
    %110 = vector.broadcast %109 : vector<1x128xf32> to vector<8x128xf32>
    %111 = arith.mulf %108, %110 : vector<8x128xf32>
    %112 = vector.extract_strided_slice %82 {offsets = [2, 0], sizes = [1, 128], strides = [1, 1]} : vector<3x128xf32> to vector<1x128xf32>
    %113 = vector.broadcast %112 : vector<1x128xf32> to vector<8x128xf32>
    %114 = arith.addf %111, %113 : vector<8x128xf32>
    %cst_40 = arith.constant 0.000000e+00 : f32
    %115 = vector.broadcast %cst_40 : f32 to vector<8x128xf32>
    %116 = arith.maximumf %114, %115 : vector<8x128xf32>
    %117 = arith.truncf %116 : vector<8x128xf32> to vector<8x128xbf16>
    %c0_41 = arith.constant 0 : index
    %c0_42 = arith.constant 0 : index
    %118 = vector.load %arg3[%c0_41, %c0_42] : memref<128x128xbf16, #tpu.memory_space<vmem>>, vector<128x128xbf16>
    %cst_43 = arith.constant dense<0.000000e+00> : vector<8x128xf32>
    %119 = tpu.matmul %117, %118, %cst_43 {dimension_numbers = #tpu.dot_dimension_numbers<[1], [0], [0], [1], [0, 0, 1, 1], [], []>} : vector<8x128xbf16>, vector<128x128xbf16>, vector<8x128xf32> -> vector<8x128xf32>
    %c0_44 = arith.constant 0 : index
    %c0_45 = arith.constant 0 : index
    %120 = vector.load %arg4[%c0_44, %c0_45] : memref<1x128xf32, #tpu.memory_space<vmem>>, vector<1x128xf32>
    %121 = vector.broadcast %120 : vector<1x128xf32> to vector<8x128xf32>
    %122 = arith.addf %119, %121 : vector<8x128xf32>
    %cst_46 = arith.constant 5.000000e-01 : f32
    %123 = vector.broadcast %cst_46 : f32 to vector<8x128xf32>
    %124 = arith.mulf %123, %122 : vector<8x128xf32>
    %125 = math.tanh %124 : vector<8x128xf32>
    %cst_47 = arith.constant 5.000000e-01 : f32
    %126 = vector.broadcast %cst_47 : f32 to vector<8x128xf32>
    %127 = arith.mulf %126, %125 : vector<8x128xf32>
    %cst_48 = arith.constant 5.000000e-01 : f32
    %128 = vector.broadcast %cst_48 : f32 to vector<8x128xf32>
    %129 = arith.addf %127, %128 : vector<8x128xf32>
    %c0_49 = arith.constant 0 : index
    %c0_50 = arith.constant 0 : index
    %130 = vector.load %arg5[%c0_49, %c0_50] : memref<8x128xf32, #tpu.memory_space<vmem>>, vector<8x128xf32>
    tpu.vector_store %arg5[%c0_49, %c0_50], %129 {strides = array<i32>} : memref<8x128xf32, #tpu.memory_space<vmem>>, vector<8x128xf32>,
    return
  }
}

</mosaic_0001>

<bundles_post_ra>
// kernel: tpu_custom_call.1
= control target key start
LH: loop header
LB: loop body
LE: loop exit
PB: predicated region body
PF: predicated region fallthrough
CT: control target
= control target key end

     0   :  { %10 = vsyncpa [#allocation3], 0  ;;  %s1074_s0 = inlined_call_operand.hbm [shape: f32[8,128], index: 0, kind: input, shape index: {}]   ;;  %s1075_s1 = inlined_call_operand.hbm [shape: bf16[3,128,128], index: 1, kind: input, shape index: {}]   ;;  %s1076_s2 = inlined_call_operand.hbm [shape: f32[3,3,128], index: 2, kind: input, shape index: {}]   ;;  %s1077_s3 = inlined_call_operand.hbm [shape: bf16[128,128], index: 3, kind: input, shape index: {}]   ;;  %s1078_s4 = inlined_call_operand.vmem [shape: f32[1,128], index: 4, kind: input, shape index: {}]   ;;  %s1079_s5 = inlined_call_operand.hbm [shape: f32[8,128], index: 5, kind: output, shape index: {}]  }
   0x1   :  { %11 = vsyncpa [#allocation6], 0 }
   0x2   :  { %12 = vsyncpa [#allocation9], 0 }
   0x3   :  { %13 = vsyncpa [#allocation4], 0  ;;  %s953_s18 = smov [#allocation5]  }
   0x4   :  { %s29_s19 = sshll.u32 %s953_s18, 4  ;;  %s30_s19 = int_to_ptr.vmem [resolvable:$true] %s29_s19 }
   0x5   :  { %s853_s20 = scalar_lea.vmem %s30_s19, 3072  ;;  %p858_p1 = scmp.lt.s32.totalorder %s30_s19, %s30_s19 }
   0x6   :  { %p854_p0 = scmp.ne.s32.totalorder %s30_s19, %s853_s20  ;;  %p859_p2 = scmp.lt.s32.totalorder %s853_s20, %s853_s20 }
   0x8   :  { %p860_p3 = por %p859_p2, %p858_p1 }
   0xa   :  { %p861_p4 = pnand %p860_p3, %p854_p0 }
   0xc   :  { %864 = shalt.err (!%p861_p4)
}
   0xd   :  { %s954_s21 = smov 64   ;;  %s955_s22 = smov 4  }
   0xe   :  { %35 = dma.hbm_to_vmem [thread:$0]  %s1075_s1, 3072, %s30_s19, [#allocation6], %s954_s21, %s954_s21, %s955_s22  }
   0xf   :  { %s956_s25 = smov [#allocation2]   ;;  %s957_s27 = smov [#allocation7]  }
  0x10   :  { %s20_s26 = sshll.u32 %s956_s25, 4  ;;  %s41_s28 = sshll.u32 %s957_s27, 4  ;;  %s21_s26 = int_to_ptr.vmem [resolvable:$true] %s20_s26  ;;  %s42_s28 = int_to_ptr.vmem [resolvable:$true] %s41_s28 }
  0x11   :  { %s873_s29 = scalar_lea.vmem %s21_s26, 128  ;;  %p878_p6 = scmp.lt.s32.totalorder %s21_s26, %s21_s26 }
  0x12   :  { %p874_p5 = scmp.ne.s32.totalorder %s21_s26, %s873_s29  ;;  %p879_p7 = scmp.lt.s32.totalorder %s873_s29, %s873_s29 }
  0x14   :  { %p880_p8 = por %p879_p7, %p878_p6 }
  0x16   :  { %p881_p9 = pnand %p880_p8, %p874_p5 }
  0x18   :  { %884 = shalt.err (!%p881_p9)
}
  0x19   :  { %23 = dma.hbm_to_vmem [thread:$0]  %s1074_s0, 128, %s21_s26, [#allocation3]  }
  0x1a   :  { %s893_s7 = scalar_lea.vmem %s42_s28, 192  ;;  %p898_p11 = scmp.lt.s32.totalorder %s42_s28, %s42_s28 }
  0x1b   :  { %p894_p10 = scmp.ne.s32.totalorder %s42_s28, %s893_s7  ;;  %p899_p12 = scmp.lt.s32.totalorder %s893_s7, %s893_s7 }
  0x1d   :  { %p900_p13 = por %p899_p12, %p898_p11 }
  0x1f   :  { %p901_p0 = pnand %p900_p13, %p894_p10 }
  0x21   :  { %904 = shalt.err (!%p901_p0)
}
  0x22   :  { %47 = dma.hbm_to_vmem [thread:$0]  %s1076_s2, 192, %s42_s28, [#allocation6], %s954_s21, %s954_s21, %s955_s22  }
  0x23   :  { %s958_s9 = smov [#allocation8]  }
  0x24   :  { %s53_s10 = sshll.u32 %s958_s9, 4  ;;  %s54_s10 = int_to_ptr.vmem [resolvable:$true] %s53_s10 }
  0x25   :  { %s913_s11 = scalar_lea.vmem %s54_s10, 1024  ;;  %p918_p2 = scmp.lt.s32.totalorder %s54_s10, %s54_s10 }
  0x26   :  { %p914_p1 = scmp.ne.s32.totalorder %s54_s10, %s913_s11  ;;  %p919_p3 = scmp.lt.s32.totalorder %s913_s11, %s913_s11 }
  0x28   :  { %p920_p4 = por %p919_p3, %p918_p2 }
  0x2a   :  { %p921_p5 = pnand %p920_p4, %p914_p1 }
  0x2c   :  { %924 = shalt.err (!%p921_p5)
}
  0x2d   :  { %59 = dma.hbm_to_vmem [thread:$0]  %s1077_s3, 1024, %s54_s10, [#allocation9], %s954_s21, %s954_s21, %s955_s22  }
  0x2e   :  { %945 = dma.done.wait [#allocation3], 128  }
  0x2f   :  { %946 = vsyncadd [#allocation3], 4294967168 }
  0x30   :  { %947 = dma.done.wait [#allocation6], 3264  }
  0x31   :  { %948 = vsyncadd [#allocation6], 4294964032 }
  0x32   :  { %949 = dma.done.wait [#allocation9], 1024  }
  0x33   :  { %950 = vsyncadd [#allocation9], 4294966272  ;;  %v959_v0 = vmov 0.0   ;;  %vm960_vm0 = vmmov 0   ;;  %v805_v1 = vld [vmem:[#allocation5 + $0x38] sm:$0xff]   ;;  %v806_v2 = vld [vmem:[#allocation5 + $0x30] sm:$0xff]   ;;  %v94_v19 = vlaneseq }
  0x34   :  { %716 = vmatprep.subr.bf16.mxu0 %v959_v0  ;;  %732 = vmatprep.mubr.msk.bf16.mxu0 %vm960_vm0, %v959_v0  ;;  %v807_v3 = vld [vmem:[#allocation5 + $0x28] sm:$0xff]   ;;  %v808_v4 = vld [vmem:[#allocation5 + $0x20] sm:$0xff]   ;;  %v809_v5 = vld [vmem:[#allocation5 + $0x18] sm:$0xff]   ;;  %s961_s13 = smov [#allocation10]  }
  0x35   :  { %736 = vmatprep.subr.bf16.mxu1 %v959_v0  ;;  %752 = vmatprep.mubr.msk.bf16.mxu1 %vm960_vm0, %v959_v0  ;;  %v810_v6 = vld [vmem:[#allocation5 + $0x10] sm:$0xff]   ;;  %v811_v7 = vld [vmem:[#allocation5 + $0x8] sm:$0xff]   ;;  %v812_v8 = vld [vmem:[#allocation5] sm:$0xff]   ;;  %v95_v20 = vshrl.u32 %v94_v19, 7  ;;  %s636_s14 = sshll.u32 %s961_s13, 4  ;;  %s637_s14 = int_to_ptr.vmem [resolvable:$true] %s636_s14 }
  0x36   :  { %717 = vmatpush3.bf16.msra.mxu0 %v805_v1  ;;  %v75_v9 = vld [vmem:[#allocation2] sm:$0xff]  ;;  %v814_v12 = vld [vmem:[#allocation5 + $0x70] sm:$0xff]   ;;  %v815_v13 = vld [vmem:[#allocation5 + $0x68] sm:$0xff]   ;;  %s925_s15 = scalar_lea.vmem %s637_s14, 128  ;;  %p930_p7 = scmp.lt.s32.totalorder %s637_s14, %s637_s14 }
  0x37   :  { %718 = vmatprep.subr.bf16.mxu0 %v959_v0  ;;  %v93_v10 = vpack.c.bf16 %v75_v9, %v75_v9  ;;  %v813_v11 = vld [vmem:[#allocation5 + $0x78] sm:$0xff]   ;;  %v816_v14 = vld [vmem:[#allocation5 + $0x60] sm:$0xff]   ;;  %v818_v16 = vld [vmem:[#allocation5 + $0x50] sm:$0xff]   ;;  %v1037_v21 = vsub.s32 0, %v95_v20  ;;  %v1040_v48 = vsub.s32 1, %v95_v20  ;;  %v1042_v49 = vsub.s32 2, %v95_v20  ;;  %p926_p6 = scmp.ne.s32.totalorder %s637_s14, %s925_s15  ;;  %p931_p8 = scmp.lt.s32.totalorder %s925_s15, %s925_s15 }
  0x38   :  { %737 = vmatpush3.bf16.msra.mxu1 %v813_v11  ;;  %v817_v15 = vld [vmem:[#allocation5 + $0x58] sm:$0xff]   ;;  %v819_v17 = vld [vmem:[#allocation5 + $0x48] sm:$0xff]   ;;  %v820_v18 = vld [vmem:[#allocation5 + $0x40] sm:$0xff]  }
  0x39   :  { %738 = vmatprep.subr.bf16.mxu1 %v959_v0  ;;  %v92_v22 = vld [vmem:[#allocation7] sm:$0x7]  ;;  %v821_v60 = vld [vmem:[#allocation5 + $0xb8] sm:$0xff]   ;;  %v822_v61 = vld [vmem:[#allocation5 + $0xb0] sm:$0xff]   ;;  %p932_p9 = por %p931_p8, %p930_p7 }
  0x3a   :  { %719 = vmatpush3.bf16.msra.mxu0 %v806_v2  ;;  %v97_v23 = vrot.slane %v92_v22, %v1037_v21  ;;  %v211_v51 = vrot.slane %v92_v22, %v1040_v48  ;;  %v216_v54 = vrot.slane %v92_v22, %v1042_v49  ;;  %v823_v62 = vld [vmem:[#allocation5 + $0xa8] sm:$0xff]   ;;  %v824_v63 = vld [vmem:[#allocation5 + $0xa0] sm:$0xff]   ;;  %v825_v1 = vld [vmem:[#allocation5 + $0x98] sm:$0xff]  }
  0x3b   :  { %720 = vmatprep.subr.bf16.mxu0 %v959_v0  ;;  %v826_v2 = vld [vmem:[#allocation5 + $0x90] sm:$0xff]   ;;  %p933_p10 = pnand %p932_p9, %p926_p6 }
  0x3c   :  { %739 = vmatpush3.bf16.msra.mxu1 %v814_v12 }
  0x3d   :  { %740 = vmatprep.subr.bf16.mxu1 %v959_v0 }
  0x3e   :  { %721 = vmatpush3.bf16.msra.mxu0 %v807_v3  ;;  %v827_v3 = vld [vmem:[#allocation5 + $0x88] sm:$0xff]  }
  0x3f   :  { %722 = vmatprep.subr.bf16.mxu0 %v959_v0 }
  0x40   :  { %741 = vmatpush3.bf16.msra.mxu1 %v815_v13 }
  0x41   :  { %742 = vmatprep.subr.bf16.mxu1 %v959_v0 }
  0x42   :  { %723 = vmatpush3.bf16.msra.mxu0 %v808_v4  ;;  %v828_v4 = vld [vmem:[#allocation5 + $0x80] sm:$0xff]  }
  0x43   :  { %724 = vmatprep.subr.bf16.mxu0 %v959_v0 }
  0x44   :  { %743 = vmatpush3.bf16.msra.mxu1 %v816_v14 }
  0x45   :  { %744 = vmatprep.subr.bf16.mxu1 %v959_v0 }
  0x46   :  { %725 = vmatpush3.bf16.msra.mxu0 %v809_v5  ;;  %v239_v5 = vld [vmem:[#allocation7 + $0x4] sm:$0x7] }
  0x47   :  { %726 = vmatprep.subr.bf16.mxu0 %v959_v0 }
  0x48   :  { %745 = vmatpush3.bf16.msra.mxu1 %v817_v15 }
  0x49   :  { %746 = vmatprep.subr.bf16.mxu1 %v959_v0 }
  0x4a   :  { %727 = vmatpush3.bf16.msra.mxu0 %v810_v6  ;;  %v244_v6 = vrot.slane %v239_v5, %v1037_v21 }
  0x4b   :  { %728 = vmatprep.subr.bf16.mxu0 %v959_v0 }
  0x4c   :  { %747 = vmatpush3.bf16.msra.mxu1 %v818_v16 }
  0x4d   :  { %748 = vmatprep.subr.bf16.mxu1 %v959_v0 }
  0x4e   :  { %729 = vmatpush3.bf16.msra.mxu0 %v811_v7 }
  0x4f   :  { %730 = vmatprep.subr.bf16.mxu0 %v959_v0 }
  0x50   :  { %749 = vmatpush3.bf16.msra.mxu1 %v819_v17 }
  0x51   :  { %750 = vmatprep.subr.bf16.mxu1 %v959_v0 }
  0x52   :  { %731 = vmatpush3.bf16.msra.mxu0 %v812_v8 }
  0x53   :  { %756 = vmatprep.subr.bf16.mxu0 %v959_v0 }
  0x54   :  { %751 = vmatpush3.bf16.msra.mxu1 %v820_v18 }
  0x55   :  { %733 = vmatmul.mubr.bf16.vlgmr.msra.gmra.mxu0 %v93_v10  ;;  %776 = vmatprep.subr.bf16.mxu1 %v959_v0 }
  0x56   :  { %772 = vmatprep.mubr.msk.bf16.mxu0 %vm960_vm0, %v959_v0  ;;  %757 = vmatpush3.bf16.msra.mxu0 %v821_v60 }
  0x57   :  { %758 = vmatprep.subr.bf16.mxu0 %v959_v0 }
  0x5a   :  { %759 = vmatpush3.bf16.msra.mxu0 %v822_v61 }
  0x5b   :  { %760 = vmatprep.subr.bf16.mxu0 %v959_v0 }
  0x5e   :  { %761 = vmatpush3.bf16.msra.mxu0 %v823_v62 }
  0x5f   :  { %762 = vmatprep.subr.bf16.mxu0 %v959_v0 }
  0x62   :  { %763 = vmatpush3.bf16.msra.mxu0 %v824_v63 }
  0x63   :  { %764 = vmatprep.subr.bf16.mxu0 %v959_v0 }
  0x66   :  { %765 = vmatpush3.bf16.msra.mxu0 %v825_v1 }
  0x67   :  { %766 = vmatprep.subr.bf16.mxu0 %v959_v0 }
  0x6a   :  { %767 = vmatpush3.bf16.msra.mxu0 %v826_v2 }
  0x6b   :  { %768 = vmatprep.subr.bf16.mxu0 %v959_v0 }
  0x6e   :  { %769 = vmatpush3.bf16.msra.mxu0 %v827_v3 }
  0x6f   :  { %770 = vmatprep.subr.bf16.mxu0 %v959_v0 }
  0x72   :  { %771 = vmatpush3.bf16.msra.mxu0 %v828_v4 }
 0x115   :  { %v180_v24 = vpop.f32.mrf.mxu0 }
 0x116   :  { %v181_v25 = vadd.f32 %v180_v24, %v97_v23 }
 0x117   :  { %v734_v26 = vpop.f32.mrf.mxu0 }
 0x118   :  { %v186_v27 = vrot.slane %v181_v25, 4  ;;  %v192_v28 = vmul.f32 %v181_v25, %v181_v25 }
 0x119   :  { %v183_v29 = vpop.f32.mrf.mxu0 }
 0x11a   :  { %v187_v30 = vadd.f32 %v186_v27, %v181_v25  ;;  %v193_v31 = vrot.slane %v192_v28, 4 }
 0x11b   :  { %v735_v32 = vpop.f32.mrf.mxu0 }
 0x11c   :  { %v188_v33 = vrot.slane %v187_v30, 2  ;;  %v194_v34 = vadd.f32 %v193_v31, %v192_v28 }
 0x11e   :  { %v189_v35 = vadd.f32 %v188_v33, %v187_v30  ;;  %v195_v36 = vrot.slane %v194_v34, 2 }
 0x120   :  { %v190_v37 = vrot.slane %v189_v35, 1  ;;  %v196_v38 = vadd.f32 %v195_v36, %v194_v34  ;;  %v359_v34 = vrot.slane %v239_v5, %v1040_v48 }
 0x122   :  { %v191_v39 = vadd.f32 %v190_v37, %v189_v35  ;;  %v197_v40 = vrot.slane %v196_v38, 1  ;;  %v364_v37 = vrot.slane %v239_v5, %v1042_v49 }
 0x124   :  { %v198_v41 = vadd.f32 %v197_v40, %v196_v38  ;;  %v199_v42 = vmul.f32 0.125, %v191_v39 }
 0x126   :  { %v200_v43 = vmul.f32 0.125, %v198_v41  ;;  %v201_v44 = vmul.f32 %v199_v42, %v199_v42  ;;  %v204_v50 = vsub.f32 %v181_v25, %v199_v42  ;;  %v829_v42 = vld [vmem:[#allocation8 + $0x38] sm:$0xff]  }
 0x128   :  { %v202_v45 = vsub.f32 %v200_v43, %v201_v44  ;;  %v830_v43 = vld [vmem:[#allocation8 + $0x30] sm:$0xff]   ;;  %v831_v44 = vld [vmem:[#allocation8 + $0x28] sm:$0xff]  }
 0x12a   :  { %v203_v46 = vmax.f32 %v202_v45, 0.0  ;;  %v832_v45 = vld [vmem:[#allocation8 + $0x20] sm:$0xff]  }
 0x12c   :  { %v205_v47 = vadd.f32 1e-05, %v203_v46  ;;  %v833_v46 = vld [vmem:[#allocation8 + $0x18] sm:$0xff]  }
 0x12e   :  { %837 = vrsqrt.f32 %v205_v47  ;;  %v834_v47 = vld [vmem:[#allocation8 + $0x10] sm:$0xff]  }
 0x13b   :  { %v838_v52 = vpop.eup %837 }
 0x13c   :  { %v207_v53 = vmul.f32 %v838_v52, %v204_v50  ;;  %v835_v50 = vld [vmem:[#allocation8 + $0x8] sm:$0xff]   ;;  %v385_v52 = vld [vmem:[#allocation7 + $0x8] sm:$0x7] }
 0x13e   :  { %v212_v55 = vmul.f32 %v211_v51, %v207_v53  ;;  %v836_v51 = vld [vmem:[#allocation8] sm:$0xff]   ;;  %v390_v53 = vrot.slane %v385_v52, %v1037_v21 }
 0x140   :  { %v217_v56 = vadd.f32 %v216_v54, %v212_v55 }
 0x142   :  { %vm218_vm1 = vcmp.ge.f32.partialorder %v217_v56, 0.0  ;;  %v219_v57 = vmul.f32 0.01, %v217_v56 }
 0x144   :  { %v220_v58 = vsel %vm218_vm1, %v217_v56, %v219_v57 }
 0x145   :  { %v240_v59 = vpack.c.bf16 %v220_v58, %v220_v58 }
 0x147   :  { %753 = vmatmul.mubr.bf16.vlgmr.msra.gmra.mxu1 %v240_v59 }
 0x148   :  { %792 = vmatprep.mubr.msk.bf16.mxu1 %vm960_vm0, %v959_v0  ;;  %777 = vmatpush3.bf16.msra.mxu1 %v829_v42 }
 0x149   :  { %778 = vmatprep.subr.bf16.mxu1 %v959_v0 }
 0x14c   :  { %779 = vmatpush3.bf16.msra.mxu1 %v830_v43 }
 0x14d   :  { %780 = vmatprep.subr.bf16.mxu1 %v959_v0 }
 0x150   :  { %781 = vmatpush3.bf16.msra.mxu1 %v831_v44 }
 0x151   :  { %782 = vmatprep.subr.bf16.mxu1 %v959_v0 }
 0x154   :  { %783 = vmatpush3.bf16.msra.mxu1 %v832_v45 }
 0x155   :  { %784 = vmatprep.subr.bf16.mxu1 %v959_v0 }
 0x158   :  { %785 = vmatpush3.bf16.msra.mxu1 %v833_v46 }
 0x159   :  { %786 = vmatprep.subr.bf16.mxu1 %v959_v0 }
 0x15c   :  { %787 = vmatpush3.bf16.msra.mxu1 %v834_v47 }
 0x15d   :  { %788 = vmatprep.subr.bf16.mxu1 %v959_v0 }
 0x160   :  { %789 = vmatpush3.bf16.msra.mxu1 %v835_v50 }
 0x161   :  { %790 = vmatprep.subr.bf16.mxu1 %v959_v0 }
 0x164   :  { %791 = vmatpush3.bf16.msra.mxu1 %v836_v51 }
 0x207   :  { %v327_v7 = vpop.f32.mrf.mxu1 }
 0x208   :  { %v328_v8 = vadd.f32 %v327_v7, %v244_v6 }
 0x209   :  { %v754_v9 = vpop.f32.mrf.mxu1 }
 0x20a   :  { %v333_v10 = vadd.f32 %v328_v8, %v220_v58 }
 0x20b   :  { %v330_v11 = vpop.f32.mrf.mxu1 }
 0x20c   :  { %v334_v12 = vrot.slane %v333_v10, 4  ;;  %v340_v13 = vmul.f32 %v333_v10, %v333_v10 }
 0x20d   :  { %v755_v14 = vpop.f32.mrf.mxu1 }
 0x20e   :  { %v335_v15 = vadd.f32 %v334_v12, %v333_v10  ;;  %v341_v16 = vrot.slane %v340_v13, 4 }
 0x210   :  { %v336_v17 = vrot.slane %v335_v15, 2  ;;  %v342_v18 = vadd.f32 %v341_v16, %v340_v13 }
 0x212   :  { %v337_v19 = vadd.f32 %v336_v17, %v335_v15  ;;  %v343_v20 = vrot.slane %v342_v18, 2  ;;  %v505_v15 = vrot.slane %v385_v52, %v1040_v48 }
 0x214   :  { %v338_v22 = vrot.slane %v337_v19, 1  ;;  %v344_v23 = vadd.f32 %v343_v20, %v342_v18  ;;  %v510_v18 = vrot.slane %v385_v52, %v1042_v49 }
 0x216   :  { %v339_v24 = vadd.f32 %v338_v22, %v337_v19  ;;  %v345_v25 = vrot.slane %v344_v23, 1 }
 0x218   :  { %v346_v26 = vadd.f32 %v345_v25, %v344_v23  ;;  %v347_v27 = vmul.f32 0.125, %v339_v24  ;;  %v671_v24 = vld [vmem:[%s1078_s4] ss:$0 sm:$0xff] }
 0x21a   :  { %v348_v28 = vmul.f32 0.125, %v346_v26  ;;  %v349_v29 = vmul.f32 %v347_v27, %v347_v27  ;;  %v352_v33 = vsub.f32 %v333_v10, %v347_v27 }
 0x21c   :  { %v350_v30 = vsub.f32 %v348_v28, %v349_v29 }
 0x21e   :  { %v351_v31 = vmax.f32 %v350_v30, 0.0 }
 0x220   :  { %v353_v32 = vadd.f32 1e-05, %v351_v31 }
 0x222   :  { %839 = vrsqrt.f32 %v353_v32 }
 0x22f   :  { %v840_v35 = vpop.eup %839 }
 0x230   :  { %v355_v36 = vmul.f32 %v840_v35, %v352_v33 }
 0x232   :  { %v360_v38 = vmul.f32 %v359_v34, %v355_v36 }
 0x234   :  { %v365_v39 = vadd.f32 %v364_v37, %v360_v38 }
 0x236   :  { %v366_v40 = vmax.f32 %v365_v39, 0.0 }
 0x238   :  { %v386_v41 = vpack.c.bf16 %v366_v40, %v366_v40 }
 0x23a   :  { %773 = vmatmul.mubr.bf16.vlgmr.msra.gmra.mxu0 %v386_v41 }
 0x2fa   :  { %v473_v54 = vpop.f32.mrf.mxu0 }
 0x2fb   :  { %v474_v55 = vadd.f32 %v473_v54, %v390_v53 }
 0x2fc   :  { %v774_v56 = vpop.f32.mrf.mxu0 }
 0x2fd   :  { %v479_v57 = vadd.f32 %v474_v55, %v366_v40 }
 0x2fe   :  { %v476_v58 = vpop.f32.mrf.mxu0 }
 0x2ff   :  { %v480_v59 = vrot.slane %v479_v57, 4  ;;  %v486_v60 = vmul.f32 %v479_v57, %v479_v57 }
 0x300   :  { %v775_v61 = vpop.f32.mrf.mxu0 }
 0x301   :  { %v481_v62 = vadd.f32 %v480_v59, %v479_v57  ;;  %v487_v63 = vrot.slane %v486_v60, 4 }
 0x303   :  { %v482_v1 = vrot.slane %v481_v62, 2  ;;  %v488_v2 = vadd.f32 %v487_v63, %v486_v60 }
 0x305   :  { %v483_v3 = vadd.f32 %v482_v1, %v481_v62  ;;  %v489_v4 = vrot.slane %v488_v2, 2 }
 0x307   :  { %v484_v5 = vrot.slane %v483_v3, 1  ;;  %v490_v0 = vadd.f32 %v489_v4, %v488_v2 }
 0x309   :  { %v485_v6 = vadd.f32 %v484_v5, %v483_v3  ;;  %v491_v7 = vrot.slane %v490_v0, 1 }
 0x30b   :  { %v492_v8 = vadd.f32 %v491_v7, %v490_v0  ;;  %v493_v21 = vmul.f32 0.125, %v485_v6 }
 0x30d   :  { %v494_v9 = vmul.f32 0.125, %v492_v8  ;;  %v495_v10 = vmul.f32 %v493_v21, %v493_v21  ;;  %v498_v14 = vsub.f32 %v479_v57, %v493_v21 }
 0x30f   :  { %v496_v11 = vsub.f32 %v494_v9, %v495_v10 }
 0x311   :  { %v497_v12 = vmax.f32 %v496_v11, 0.0 }
 0x313   :  { %v499_v13 = vadd.f32 1e-05, %v497_v12 }
 0x315   :  { %841 = vrsqrt.f32 %v499_v13 }
 0x322   :  { %v842_v16 = vpop.eup %841 }
 0x323   :  { %v501_v17 = vmul.f32 %v842_v16, %v498_v14 }
 0x325   :  { %v506_v19 = vmul.f32 %v505_v15, %v501_v17 }
 0x327   :  { %v511_v20 = vadd.f32 %v510_v18, %v506_v19 }
 0x329   :  { %v512_v22 = vmax.f32 %v511_v20, 0.0 }
 0x32b   :  { %v513_v23 = vpack.c.bf16 %v512_v22, %v512_v22 }
 0x32d   :  { %793 = vmatmul.mubr.bf16.vlgmr.msra.gmra.mxu1 %v513_v23 }
 0x3ed   :  { %v619_v25 = vpop.f32.mrf.mxu1 }
 0x3ee   :  { %v620_v26 = vadd.f32 %v671_v24, %v619_v25 }
 0x3ef   :  { %v794_v27 = vpop.f32.mrf.mxu1 }
 0x3f0   :  { %v625_v28 = vmul.f32 0.5, %v620_v26 }
 0x3f1   :  { %v622_v29 = vpop.f32.mrf.mxu1 }
 0x3f2   :  { %843 = vtanh.f32 %v625_v28 }
 0x3f3   :  { %v795_v48 = vpop.f32.mrf.mxu1 }
 0x3ff   :  { %v844_v30 = vpop.eup %843 }
 0x400   :  { %v627_v49 = vmul.f32 0.5, %v844_v30 }
 0x402   :  { %v628_v31 = vadd.f32 0.5, %v627_v49 }
 0x404   :  { %629 = vst [vmem:[#allocation10] sm:$0xff] %v628_v31 }
 0x405   :  { %936 = shalt.err (!%p933_p10)
}
 0x406   :  { %639 = dma.vmem_to_hbm [thread:$0]  %s637_s14, 128, %s1079_s5, [#allocation4]  }
 0x407   :  { %951 = dma.done.wait [#allocation4], 128  }
 0x408   :  { %952 = vsyncadd [#allocation4], 4294967168 }
 0x409   :  { %643 = vsyncpa [#allocation3], 1 }
 0x40a   :  { %644 = vsyncpa [#allocation6], 1 }
 0x40b   :  { %645 = vsyncpa [#allocation9], 1 }
 0x40c   :  { %646 = vsyncpa [#allocation4], 1 }

</bundles_post_ra>
